<compile_context>
chip_gen: v7x
topology: tpu7x:2x2x1
jax: 0.10.0
libtpu: 0.0.40
codegen_flags: <defaults>
</compile_context>

<pallas_src>
import functools

import jax
import jax.numpy as jnp
from jax.experimental import pallas as pl
from jax.experimental.pallas import tpu as pltpu

SUBLANE = 8  # f32 sublane count; a tiled second-to-last block dim must be a
             # multiple of this (unless it equals the full array dim).


def toy_model_kernel(x_ref, w1_ref, b1_ref, w2_ref, b2_ref, o_ref):
    """One batch tile of: Linear(10,10) -> ReLU -> Linear(10,5)."""
    # net1: bf16 x @ bf16 W1 on the MXU, accumulate in f32.
    h = jnp.dot(x_ref[...], w1_ref[...], preferred_element_type=jnp.float32)
    h = jnp.maximum(h + b1_ref[...], 0.0)          # bias + ReLU in f32 (VPU)
    # net2: bf16 h @ bf16 W2 on the MXU, accumulate in f32.
    y = jnp.dot(h.astype(jnp.bfloat16), w2_ref[...],
                preferred_element_type=jnp.float32)
    o_ref[...] = (y + b2_ref[...]).astype(o_ref.dtype)


def prepare_params(w1, b1, w2, b2):
    """One-time parameter prep (hoisted out of the per-call forward path)."""
    return (
        w1.astype(jnp.bfloat16),
        jnp.reshape(b1, (1, -1)).astype(jnp.float32),
        w2.astype(jnp.bfloat16),
        jnp.reshape(b2, (1, -1)).astype(jnp.float32),
    )


def _round_up(x, m):
    return ((x + m - 1) // m) * m


@functools.partial(jax.jit, static_argnames=("tile_b",))
def toy_model_forward(x, params, *, tile_b=4096):
    """x: (B, 10) float; params from prepare_params(). Returns (B, 5) float32."""
    w1, b1, w2, b2 = params
    B, in_dim = x.shape
    hid = w1.shape[1]
    out_dim = w2.shape[1]

    xb = x.astype(jnp.bfloat16)   # halve streamed read bytes; exact bf16 MXU path

    # Batch tile: full array when it fits in one tile (exempt from the 8-row
    # rule), otherwise a multiple of 8.  No batch padding / extra copy of x:
    # the ragged edge block (if any) is padded on read and masked on write.
    if B <= tile_b:
        tb = B
    else:
        tb = _round_up(tile_b, SUBLANE)
        if tb > B:
            tb = B

    grid = (pl.cdiv(B, tb),)

    return pl.pallas_call(
        toy_model_kernel,
        out_shape=jax.ShapeDtypeStruct((B, out_dim), jnp.float32),
        grid=grid,
        in_specs=[
            # x streams tile-by-tile over the batch axis (double-buffered DMA).
            pl.BlockSpec((tb, in_dim), lambda i: (i, 0)),
            # Weights / biases: full-array blocks with a constant index_map ->
            # DMA'd once, VMEM-resident across the whole grid.
            pl.BlockSpec((in_dim, hid), lambda i: (0, 0)),
            pl.BlockSpec((1, hid), lambda i: (0, 0)),
            pl.BlockSpec((hid, out_dim), lambda i: (0, 0)),
            pl.BlockSpec((1, out_dim), lambda i: (0, 0)),
        ],
        # Compact (B, 5) output: full-array last dim, so no 128-lane padded slab
        # in HBM and no post-kernel slice pass.
        out_specs=pl.BlockSpec((tb, out_dim), lambda i: (i, 0)),
        compiler_params=pltpu.CompilerParams(
            # Independent batch tiles -> shard across both TensorCores on v7x.
            dimension_semantics=("parallel",),
            # Headroom over v5e's 16 MiB default scoped limit; <= ~48 MiB keeps
            # slack under v7x's 64 MiB physical VMEM.
            vmem_limit_bytes=48 * 1024 * 1024,
        ),
    )(xb, w1, b1, w2, b2)


def reference_forward(x, w1, b1, w2, b2):
    """Pure-JAX reference with the same bf16 quantization points as the kernel."""
    f32 = jnp.float32
    xb = x.astype(jnp.bfloat16).astype(f32)
    w1b = w1.astype(jnp.bfloat16).astype(f32)
    w2b = w2.astype(jnp.bfloat16).astype(f32)
    h = jnp.maximum(xb @ w1b + jnp.reshape(b1, (1, -1)).astype(f32), 0.0)
    hb = h.astype(jnp.bfloat16).astype(f32)
    return hb @ w2b + jnp.reshape(b2, (1, -1)).astype(f32)


if __name__ == "__main__":
    key = jax.random.PRNGKey(0)
    k_x, k_w1, k_b1, k_w2, k_b2 = jax.random.split(key, 5)

    in_dim, hid_dim, out_dim = 10, 10, 5

    # Deterministic synthetic parameters (PyTorch nn.Linear-like uniform init).
    bound1 = 1.0 / (in_dim ** 0.5)
    bound2 = 1.0 / (hid_dim ** 0.5)
    w1 = jax.random.uniform(k_w1, (in_dim, hid_dim), jnp.float32, -bound1, bound1)
    b1 = jax.random.uniform(k_b1, (hid_dim,), jnp.float32, -bound1, bound1)
    w2 = jax.random.uniform(k_w2, (hid_dim, out_dim), jnp.float32, -bound2, bound2)
    b2 = jax.random.uniform(k_b2, (out_dim,), jnp.float32, -bound2, bound2)

    params = prepare_params(w1, b1, w2, b2)   # one-time, outside the hot path

    # Single-tile, multi-step-grid, and ragged-edge batches.
    for batch, tb in ((8, 4096), (24, 8), (20, 8)):
        x = jax.random.normal(jax.random.fold_in(k_x, batch),
                              (batch, in_dim), dtype=jnp.float32)
        out = toy_model_forward(x, params, tile_b=tb)
        jax.block_until_ready(out)

        ref = reference_forward(x, w1, b1, w2, b2)
        assert out.shape == (batch, out_dim)
        # bf16 inputs -> loosened tolerance (accumulation / rounding-point skew).
        assert jnp.allclose(out, ref, atol=2e-2, rtol=2e-2), (
            batch, float(jnp.max(jnp.abs(out - ref))))

    print("KERNEL_OK")
</pallas_src>

<mosaic_0001>
module attributes {stable_mosaic.version = 11 : i64} {
  func.func @toy_model_kernel(%arg0: i32, %arg1: memref<8x10xbf16, #tpu.memory_space<vmem>>, %arg2: memref<10x10xbf16, #tpu.memory_space<vmem>>, %arg3: memref<1x10xf32, #tpu.memory_space<vmem>>, %arg4: memref<10x5xbf16, #tpu.memory_space<vmem>>, %arg5: memref<1x5xf32, #tpu.memory_space<vmem>>, %arg6: memref<8x5xf32, #tpu.memory_space<vmem>>) attributes {dimension_semantics = [#tpu.dimension_semantics<parallel>], iteration_bounds = array<i64: 1>, scalar_prefetch = 0 : i64, scratch_operands = 0 : i64, tpu.core_type = #tpu.core_type<tc>, window_params = [{transform_indices = @transform_0, window_bounds = array<i64: 8, 10>}, {pipeline_mode = #tpu.pipeline_mode<synchronous>, transform_indices = @transform_1, window_bounds = array<i64: 10, 10>}, {pipeline_mode = #tpu.pipeline_mode<synchronous>, transform_indices = @transform_2, window_bounds = array<i64: 1, 10>}, {pipeline_mode = #tpu.pipeline_mode<synchronous>, transform_indices = @transform_3, window_bounds = array<i64: 10, 5>}, {pipeline_mode = #tpu.pipeline_mode<synchronous>, transform_indices = @transform_4, window_bounds = array<i64: 1, 5>}, {transform_indices = @transform_5, window_bounds = array<i64: 8, 5>}]} {
    %c0 = arith.constant 0 : index
    %c0_0 = arith.constant 0 : index
    %0 = vector.load %arg1[%c0, %c0_0] : memref<8x10xbf16, #tpu.memory_space<vmem>>, vector<8x10xbf16>
    %c0_1 = arith.constant 0 : index
    %c0_2 = arith.constant 0 : index
    %1 = vector.load %arg2[%c0_1, %c0_2] : memref<10x10xbf16, #tpu.memory_space<vmem>>, vector<10x10xbf16>
    %cst = arith.constant dense<0.000000e+00> : vector<8x10xf32>
    %2 = tpu.matmul %0, %1, %cst {dimension_numbers = #tpu.dot_dimension_numbers<[1], [0], [0], [1], [0, 0, 1, 1], [], []>} : vector<8x10xbf16>, vector<10x10xbf16>, vector<8x10xf32> -> vector<8x10xf32>
    %c0_3 = arith.constant 0 : index
    %c0_4 = arith.constant 0 : index
    %3 = vector.load %arg3[%c0_3, %c0_4] : memref<1x10xf32, #tpu.memory_space<vmem>>, vector<1x10xf32>
    %4 = vector.broadcast %3 : vector<1x10xf32> to vector<8x10xf32>
    %5 = arith.addf %2, %4 : vector<8x10xf32>
    %cst_5 = arith.constant 0.000000e+00 : f32
    %6 = vector.broadcast %cst_5 : f32 to vector<8x10xf32>
    %7 = arith.maximumf %5, %6 : vector<8x10xf32>
    %8 = arith.truncf %7 : vector<8x10xf32> to vector<8x10xbf16>
    %c0_6 = arith.constant 0 : index
    %c0_7 = arith.constant 0 : index
    %9 = vector.load %arg4[%c0_6, %c0_7] : memref<10x5xbf16, #tpu.memory_space<vmem>>, vector<10x5xbf16>
    %cst_8 = arith.constant dense<0.000000e+00> : vector<8x5xf32>
    %10 = tpu.matmul %8, %9, %cst_8 {dimension_numbers = #tpu.dot_dimension_numbers<[1], [0], [0], [1], [0, 0, 1, 1], [], []>} : vector<8x10xbf16>, vector<10x5xbf16>, vector<8x5xf32> -> vector<8x5xf32>
    %c0_9 = arith.constant 0 : index
    %c0_10 = arith.constant 0 : index
    %11 = vector.load %arg5[%c0_9, %c0_10] : memref<1x5xf32, #tpu.memory_space<vmem>>, vector<1x5xf32>
    %12 = vector.broadcast %11 : vector<1x5xf32> to vector<8x5xf32>
    %13 = arith.addf %10, %12 : vector<8x5xf32>
    %c0_11 = arith.constant 0 : index
    %c0_12 = arith.constant 0 : index
    %14 = vector.load %arg6[%c0_11, %c0_12] : memref<8x5xf32, #tpu.memory_space<vmem>>, vector<8x5xf32>
    tpu.vector_store %arg6[%c0_11, %c0_12], %13 {strides = array<i32>} : memref<8x5xf32, #tpu.memory_space<vmem>>, vector<8x5xf32>,
    return
  }
  func.func @transform_0(%arg0: i32) -> (i32, i32) {
    %c0_i32 = arith.constant 0 : i32
    %c0_i32_0 = arith.constant 0 : i32
    return %arg0, %c0_i32 : i32, i32
  }
  func.func @transform_1(%arg0: i32) -> (i32, i32) {
    %c0_i32 = arith.constant 0 : i32
    %c0_i32_0 = arith.constant 0 : i32
    %c0_i32_1 = arith.constant 0 : i32
    return %c0_i32, %c0_i32_0 : i32, i32
  }
  func.func @transform_2(%arg0: i32) -> (i32, i32) {
    %c0_i32 = arith.constant 0 : i32
    %c0_i32_0 = arith.constant 0 : i32
    %c0_i32_1 = arith.constant 0 : i32
    return %c0_i32, %c0_i32_0 : i32, i32
  }
  func.func @transform_3(%arg0: i32) -> (i32, i32) {
    %c0_i32 = arith.constant 0 : i32
    %c0_i32_0 = arith.constant 0 : i32
    %c0_i32_1 = arith.constant 0 : i32
    return %c0_i32, %c0_i32_0 : i32, i32
  }
  func.func @transform_4(%arg0: i32) -> (i32, i32) {
    %c0_i32 = arith.constant 0 : i32
    %c0_i32_0 = arith.constant 0 : i32
    %c0_i32_1 = arith.constant 0 : i32
    return %c0_i32, %c0_i32_0 : i32, i32
  }
  func.func @transform_5(%arg0: i32) -> (i32, i32) {
    %c0_i32 = arith.constant 0 : i32
    %c0_i32_0 = arith.constant 0 : i32
    return %arg0, %c0_i32 : i32, i32
  }
}

</mosaic_0001>

<bundles_post_ra>
// kernel: toy_model_forward.1
= control target key start
LH: loop header
LB: loop body
LE: loop exit
PB: predicated region body
PF: predicated region fallthrough
CT: control target
= control target key end

     0   :  { %vm41_vm0 = vcmask 1044480   ;;  %v214_v0 = vmov 0.0   ;;  %vm215_vm1 = vmmov 0   ;;  %s274_s0 = inlined_call_operand.vmem [shape: bf16[8,10], index: 0, kind: input, shape index: {}]   ;;  %s275_s1 = inlined_call_operand.vmem [shape: bf16[10,10], index: 1, kind: input, shape index: {}]   ;;  %s276_s2 = inlined_call_operand.vmem [shape: f32[1,10], index: 2, kind: input, shape index: {}]   ;;  %s277_s3 = inlined_call_operand.vmem [shape: bf16[10,5], index: 3, kind: input, shape index: {}]   ;;  %s278_s4 = inlined_call_operand.vmem [shape: f32[1,5], index: 4, kind: input, shape index: {}]   ;;  %s279_s5 = inlined_call_operand.hbm [shape: f32[8,5], index: 5, kind: output, shape index: {}]  }
   0x1   :  { %173 = vmatprep.subr.bf16.mxu0 %v214_v0  ;;  %v188_v1 = vld [vmem:[%s275_s1] sm:$0x1f]   ;;  %179 = vmatprep.subr.bf16.mxu1 %v214_v0 }
   0x2   :  { %175 = vmatprep.mubr.msk.bf16.mxu0 %vm215_vm1, %v214_v0  ;;  %181 = vmatprep.mubr.msk.bf16.mxu1 %vm215_vm1, %v214_v0  ;;  %v43_v2 = vsel %vm41_vm0, %v188_v1, 0 }
   0x3   :  { %10 = vsyncpa [#allocation3], 0  ;;  %174 = vmatpush3.bf16.msra.mxu0 %v43_v2  ;;  %v22_v3 = vld [vmem:[%s274_s0] sm:$0xf]  ;;  %vm37_vm2 = vcmask 80896   ;;  %s216_s26 = smov [#allocation2]  }
   0x4   :  { %v189_v4 = vld [vmem:[%s277_s3] sm:$0x1f]   ;;  %s155_s3 = sshll.u32 %s216_s26, 4  ;;  %vm147_vm3 = vcmask 39936   ;;  %s156_s3 = int_to_ptr.vmem [resolvable:$true] %s155_s3 }
   0x5   :  { %v105_v5 = vsel %vm41_vm0, %v189_v4, 0  ;;  %v163_v6 = vld [vmem:[%s276_s2] ss:$0 sm:$0xff]  ;;  %s190_s2 = scalar_lea.vmem %s156_s3, 128  ;;  %p195_p1 = scmp.lt.s32.totalorder %s156_s3, %s156_s3 }
   0x6   :  { %176 = vmatmul.mubr.msk.bf16.vlgmr.msra.gmra.mrb[0].mxu0 %vm37_vm2, %v22_v3  ;;  %180 = vmatpush3.bf16.msra.mxu1 %v105_v5  ;;  %v166_v14 = vld [vmem:[%s278_s4] ss:$0 sm:$0xff]  ;;  %p191_p0 = scmp.ne.s32.totalorder %s156_s3, %s190_s2  ;;  %p196_p2 = scmp.lt.s32.totalorder %s190_s2, %s190_s2 }
   0x8   :  { %p197_p3 = por %p196_p2, %p195_p1 }
   0xa   :  { %p198_p4 = pnand %p197_p3, %p191_p0 }
  0xd9   :  { %v79_v7 = vpop.f32.mrb[0].mxu0 }
  0xda   :  { %v80_v8 = vadd.f32 %v163_v6, %v79_v7  ;;  %v177_v9 = vpop.f32.mrb[1].mxu0 }
  0xdb   :  { %v82_v10 = vpop.f32.mrb[2].mxu0 }
  0xdc   :  { %v85_v11 = vmax.f32 %v80_v8, 0.0  ;;  %v178_v12 = vpop.f32.mrb[3].mxu0 }
  0xde   :  { %v86_v13 = vpack.c.bf16 %v85_v11, %v85_v11 }
  0xe0   :  { %182 = vmatmul.mubr.msk.bf16.vlgmr.msra.gmra.mrb[0].mxu1 %vm37_vm2, %v86_v13 }
 0x1b3   :  { %v141_v15 = vpop.f32.mrb[0].mxu1 }
 0x1b4   :  { %v142_v16 = vadd.f32 %v166_v14, %v141_v15  ;;  %v183_v17 = vpop.f32.mrb[1].mxu1 }
 0x1b5   :  { %v144_v18 = vpop.f32.mrb[2].mxu1 }
 0x1b6   :  { %v184_v19 = vpop.f32.mrb[3].mxu1  ;;  %148 = vst.msk [vmem:[#allocation2] sm:$0xff] %vm147_vm3, %v142_v16 }
 0x1b7   :  { %201 = shalt.err (!%p198_p4)
}
 0x1b8   :  { %s202_s4 = scalar_lea.hbm %s279_s5, 128 }
 0x1b9   :  { %p203_p5 = scmp.ne.s32.totalorder %s279_s5, %s202_s4  ;;  %p206_p6 = scmp.lt.u32.totalorder %s202_s4, %s279_s5 }
 0x1bb   :  { %p208_p7 = pnand %p206_p6, %p203_p5 }
 0x1bd   :  { %211 = shalt.err (!%p208_p7)
}
 0x1be   :  { %158 = dma.vmem_to_hbm [thread:$0]  %s156_s3, 128, %s279_s5, [#allocation3]  }
 0x1bf   :  { %212 = dma.done.wait [#allocation3], 128  }
 0x1c0   :  { %213 = vsyncadd [#allocation3], 4294967168 }
 0x1c1   :  { %162 = vsyncpa [#allocation3], 1 }

</bundles_post_ra>
